<compile_context>
chip_gen: v5e
topology: v5e:2x2
jax: 0.10.0
libtpu: 0.0.40
codegen_flags: <defaults>
</compile_context>

<pallas_src>
import math
import functools

import jax
import jax.numpy as jnp
from jax.experimental import pallas as pl
from jax.experimental.pallas import tpu as pltpu

D_MODEL = 128      # lane-dense embedding width
VOCAB = 512


def _embed_kernel(ids_ref, table_hbm, o_ref, rows_ref, sem_ref, *,
                  scale, n_tokens, vocab):
    """Gather n_tokens rows from the HBM table, scale by sqrt(d_model).

    ids_ref   : SMEM (N,)   int32   flattened token ids
    table_hbm : ANY  (V,D)  float32 embedding table (left in HBM)
    o_ref     : VMEM (N,D)  float32 output embeddings
    rows_ref  : VMEM (N,D)  float32 scratch filled by the row DMAs
    sem_ref   : DMA semaphores, shape (N,)
    """
    # ---- Issue all row gathers (overlapped small DMAs, one per token). ----
    # Scalar id reads happen here, before any .wait().
    for i in range(n_tokens):
        tok = ids_ref[i]
        tok = jnp.minimum(jnp.maximum(tok, 0), vocab - 1)   # bounds-check id
        pltpu.make_async_copy(
            table_hbm.at[pl.ds(tok, 1), :],
            rows_ref.at[pl.ds(i, 1), :],
            sem_ref.at[i],
        ).start()

    # ---- Wait for all DMAs (semaphore + byte count is what matters). ----
    for i in range(n_tokens):
        pltpu.make_async_copy(
            table_hbm.at[pl.ds(0, 1), :],          # placeholder src for wait
            rows_ref.at[pl.ds(i, 1), :],
            sem_ref.at[i],
        ).wait()

    # ---- Single full-slab scale + store (hoisted sqrt(d_model) multiply). --
    o_ref[...] = rows_ref[...] * scale


def input_embeddings(ids, table):
    """ids: (B, S) int token ids; table: (V, D) float32. Returns (B, S, D)."""
    B, S = ids.shape
    V, D = table.shape
    N = B * S
    scale = math.sqrt(D)

    ids_flat = ids.reshape(N).astype(jnp.int32)
    kernel = functools.partial(_embed_kernel, scale=scale, n_tokens=N, vocab=V)

    out = pl.pallas_call(
        kernel,
        out_shape=jax.ShapeDtypeStruct((N, D), table.dtype),
        in_specs=[
            pl.BlockSpec(memory_space=pltpu.MemorySpace.SMEM),  # token ids
            pl.BlockSpec(memory_space=pl.ANY),                  # table in HBM
        ],
        out_specs=pl.BlockSpec(memory_space=pltpu.MemorySpace.VMEM),
        scratch_shapes=[
            pltpu.VMEM((N, D), table.dtype),        # gathered rows
            pltpu.SemaphoreType.DMA((N,)),          # one sem per row DMA
        ],
        cost_estimate=pl.CostEstimate(
            flops=N * D,                            # the scale multiply
            transcendentals=0,
            bytes_accessed=N * 4 + 2 * N * D * 4,   # ids + rows read + out
        ),
    )(ids_flat, table)

    return out.reshape(B, S, D)


if __name__ == "__main__":
    B, S = 2, 8

    key = jax.random.PRNGKey(0)
    k_ids, k_tab = jax.random.split(key)
    ids = jax.random.randint(k_ids, (B, S), 0, VOCAB, dtype=jnp.int32)
    table = jax.random.normal(k_tab, (VOCAB, D_MODEL), jnp.float32)

    out = input_embeddings(ids, table)
    out = jax.block_until_ready(out)

    # pure-JAX reference: nn.Embedding lookup * sqrt(d_model)
    ref = table[ids] * math.sqrt(D_MODEL)

    assert out.shape == (B, S, D_MODEL)
    assert jnp.allclose(out, ref, atol=1e-6, rtol=1e-6), "mismatch vs JAX reference"

    print("KERNEL_OK")
</pallas_src>

<mosaic_0001>
module attributes {stable_mosaic.version = 11 : i64} {
  func.func @_embed_kernel(%arg0: memref<16xi32, #tpu.memory_space<smem>>, %arg1: memref<512x128xf32, #tpu.memory_space<any>>, %arg2: memref<16x128xf32, #tpu.memory_space<vmem>>, %arg3: memref<16x128xf32, #tpu.memory_space<vmem>>, %arg4: memref<16x!tpu.dma_semaphore, #tpu.memory_space<semaphore_mem>>) attributes {dimension_semantics = [], scalar_prefetch = 0 : i64, scratch_operands = 2 : i64, tpu.core_type = #tpu.core_type<tc>} {
    %c0 = arith.constant 0 : index
    %0 = memref.load %arg0[%c0] : memref<16xi32, #tpu.memory_space<smem>>
    %c0_i32 = arith.constant 0 : i32
    %1 = arith.maxsi %0, %c0_i32 : i32
    %c511_i32 = arith.constant 511 : i32
    %2 = arith.minsi %1, %c511_i32 : i32
    %c0_i32_0 = arith.constant 0 : i32
    %c0_i32_1 = arith.constant 0 : i32
    %3 = tpu.memref_slice %arg1[%2, %c0_i32_1] : memref<512x128xf32, #tpu.memory_space<any>> -> memref<1x128xf32, #tpu.memory_space<any>>
    %c0_i32_2 = arith.constant 0 : i32
    %c0_i32_3 = arith.constant 0 : i32
    %4 = tpu.memref_slice %arg3[%c0_i32_2, %c0_i32_3] : memref<16x128xf32, #tpu.memory_space<vmem>> -> memref<1x128xf32, #tpu.memory_space<vmem>>
    %5 = tpu.memref_slice %arg4[%c0_i32_0] : memref<16x!tpu.dma_semaphore, #tpu.memory_space<semaphore_mem>> -> memref<1x!tpu.dma_semaphore, #tpu.memory_space<semaphore_mem>>
    %6 = tpu.memref_squeeze %5 : memref<1x!tpu.dma_semaphore, #tpu.memory_space<semaphore_mem>> -> memref<!tpu.dma_semaphore, #tpu.memory_space<semaphore_mem>>
    tpu.enqueue_dma source(%3 : memref<1x128xf32, #tpu.memory_space<any>>) target(%4 : memref<1x128xf32, #tpu.memory_space<vmem>>) target_semaphore(%6 : memref<!tpu.dma_semaphore, #tpu.memory_space<semaphore_mem>>)
    %c1 = arith.constant 1 : index
    %7 = memref.load %arg0[%c1] : memref<16xi32, #tpu.memory_space<smem>>
    %c0_i32_4 = arith.constant 0 : i32
    %8 = arith.maxsi %7, %c0_i32_4 : i32
    %c511_i32_5 = arith.constant 511 : i32
    %9 = arith.minsi %8, %c511_i32_5 : i32
    %c1_i32 = arith.constant 1 : i32
    %c0_i32_6 = arith.constant 0 : i32
    %10 = tpu.memref_slice %arg1[%9, %c0_i32_6] : memref<512x128xf32, #tpu.memory_space<any>> -> memref<1x128xf32, #tpu.memory_space<any>>
    %c1_i32_7 = arith.constant 1 : i32
    %c0_i32_8 = arith.constant 0 : i32
    %11 = tpu.memref_slice %arg3[%c1_i32_7, %c0_i32_8] : memref<16x128xf32, #tpu.memory_space<vmem>> -> memref<1x128xf32, #tpu.memory_space<vmem>>
    %12 = tpu.memref_slice %arg4[%c1_i32] : memref<16x!tpu.dma_semaphore, #tpu.memory_space<semaphore_mem>> -> memref<1x!tpu.dma_semaphore, #tpu.memory_space<semaphore_mem>>
    %13 = tpu.memref_squeeze %12 : memref<1x!tpu.dma_semaphore, #tpu.memory_space<semaphore_mem>> -> memref<!tpu.dma_semaphore, #tpu.memory_space<semaphore_mem>>
    tpu.enqueue_dma source(%10 : memref<1x128xf32, #tpu.memory_space<any>>) target(%11 : memref<1x128xf32, #tpu.memory_space<vmem>>) target_semaphore(%13 : memref<!tpu.dma_semaphore, #tpu.memory_space<semaphore_mem>>)
    %c2 = arith.constant 2 : index
    %14 = memref.load %arg0[%c2] : memref<16xi32, #tpu.memory_space<smem>>
    %c0_i32_9 = arith.constant 0 : i32
    %15 = arith.maxsi %14, %c0_i32_9 : i32
    %c511_i32_10 = arith.constant 511 : i32
    %16 = arith.minsi %15, %c511_i32_10 : i32
    %c2_i32 = arith.constant 2 : i32
    %c0_i32_11 = arith.constant 0 : i32
    %17 = tpu.memref_slice %arg1[%16, %c0_i32_11] : memref<512x128xf32, #tpu.memory_space<any>> -> memref<1x128xf32, #tpu.memory_space<any>>
    %c2_i32_12 = arith.constant 2 : i32
    %c0_i32_13 = arith.constant 0 : i32
    %18 = tpu.memref_slice %arg3[%c2_i32_12, %c0_i32_13] : memref<16x128xf32, #tpu.memory_space<vmem>> -> memref<1x128xf32, #tpu.memory_space<vmem>>
    %19 = tpu.memref_slice %arg4[%c2_i32] : memref<16x!tpu.dma_semaphore, #tpu.memory_space<semaphore_mem>> -> memref<1x!tpu.dma_semaphore, #tpu.memory_space<semaphore_mem>>
    %20 = tpu.memref_squeeze %19 : memref<1x!tpu.dma_semaphore, #tpu.memory_space<semaphore_mem>> -> memref<!tpu.dma_semaphore, #tpu.memory_space<semaphore_mem>>
    tpu.enqueue_dma source(%17 : memref<1x128xf32, #tpu.memory_space<any>>) target(%18 : memref<1x128xf32, #tpu.memory_space<vmem>>) target_semaphore(%20 : memref<!tpu.dma_semaphore, #tpu.memory_space<semaphore_mem>>)
    %c3 = arith.constant 3 : index
    %21 = memref.load %arg0[%c3] : memref<16xi32, #tpu.memory_space<smem>>
    %c0_i32_14 = arith.constant 0 : i32
    %22 = arith.maxsi %21, %c0_i32_14 : i32
    %c511_i32_15 = arith.constant 511 : i32
    %23 = arith.minsi %22, %c511_i32_15 : i32
    %c3_i32 = arith.constant 3 : i32
    %c0_i32_16 = arith.constant 0 : i32
    %24 = tpu.memref_slice %arg1[%23, %c0_i32_16] : memref<512x128xf32, #tpu.memory_space<any>> -> memref<1x128xf32, #tpu.memory_space<any>>
    %c3_i32_17 = arith.constant 3 : i32
    %c0_i32_18 = arith.constant 0 : i32
    %25 = tpu.memref_slice %arg3[%c3_i32_17, %c0_i32_18] : memref<16x128xf32, #tpu.memory_space<vmem>> -> memref<1x128xf32, #tpu.memory_space<vmem>>
    %26 = tpu.memref_slice %arg4[%c3_i32] : memref<16x!tpu.dma_semaphore, #tpu.memory_space<semaphore_mem>> -> memref<1x!tpu.dma_semaphore, #tpu.memory_space<semaphore_mem>>
    %27 = tpu.memref_squeeze %26 : memref<1x!tpu.dma_semaphore, #tpu.memory_space<semaphore_mem>> -> memref<!tpu.dma_semaphore, #tpu.memory_space<semaphore_mem>>
    tpu.enqueue_dma source(%24 : memref<1x128xf32, #tpu.memory_space<any>>) target(%25 : memref<1x128xf32, #tpu.memory_space<vmem>>) target_semaphore(%27 : memref<!tpu.dma_semaphore, #tpu.memory_space<semaphore_mem>>)
    %c4 = arith.constant 4 : index
    %28 = memref.load %arg0[%c4] : memref<16xi32, #tpu.memory_space<smem>>
    %c0_i32_19 = arith.constant 0 : i32
    %29 = arith.maxsi %28, %c0_i32_19 : i32
    %c511_i32_20 = arith.constant 511 : i32
    %30 = arith.minsi %29, %c511_i32_20 : i32
    %c4_i32 = arith.constant 4 : i32
    %c0_i32_21 = arith.constant 0 : i32
    %31 = tpu.memref_slice %arg1[%30, %c0_i32_21] : memref<512x128xf32, #tpu.memory_space<any>> -> memref<1x128xf32, #tpu.memory_space<any>>
    %c4_i32_22 = arith.constant 4 : i32
    %c0_i32_23 = arith.constant 0 : i32
    %32 = tpu.memref_slice %arg3[%c4_i32_22, %c0_i32_23] : memref<16x128xf32, #tpu.memory_space<vmem>> -> memref<1x128xf32, #tpu.memory_space<vmem>>
    %33 = tpu.memref_slice %arg4[%c4_i32] : memref<16x!tpu.dma_semaphore, #tpu.memory_space<semaphore_mem>> -> memref<1x!tpu.dma_semaphore, #tpu.memory_space<semaphore_mem>>
    %34 = tpu.memref_squeeze %33 : memref<1x!tpu.dma_semaphore, #tpu.memory_space<semaphore_mem>> -> memref<!tpu.dma_semaphore, #tpu.memory_space<semaphore_mem>>
    tpu.enqueue_dma source(%31 : memref<1x128xf32, #tpu.memory_space<any>>) target(%32 : memref<1x128xf32, #tpu.memory_space<vmem>>) target_semaphore(%34 : memref<!tpu.dma_semaphore, #tpu.memory_space<semaphore_mem>>)
    %c5 = arith.constant 5 : index
    %35 = memref.load %arg0[%c5] : memref<16xi32, #tpu.memory_space<smem>>
    %c0_i32_24 = arith.constant 0 : i32
    %36 = arith.maxsi %35, %c0_i32_24 : i32
    %c511_i32_25 = arith.constant 511 : i32
    %37 = arith.minsi %36, %c511_i32_25 : i32
    %c5_i32 = arith.constant 5 : i32
    %c0_i32_26 = arith.constant 0 : i32
    %38 = tpu.memref_slice %arg1[%37, %c0_i32_26] : memref<512x128xf32, #tpu.memory_space<any>> -> memref<1x128xf32, #tpu.memory_space<any>>
    %c5_i32_27 = arith.constant 5 : i32
    %c0_i32_28 = arith.constant 0 : i32
    %39 = tpu.memref_slice %arg3[%c5_i32_27, %c0_i32_28] : memref<16x128xf32, #tpu.memory_space<vmem>> -> memref<1x128xf32, #tpu.memory_space<vmem>>
    %40 = tpu.memref_slice %arg4[%c5_i32] : memref<16x!tpu.dma_semaphore, #tpu.memory_space<semaphore_mem>> -> memref<1x!tpu.dma_semaphore, #tpu.memory_space<semaphore_mem>>
    %41 = tpu.memref_squeeze %40 : memref<1x!tpu.dma_semaphore, #tpu.memory_space<semaphore_mem>> -> memref<!tpu.dma_semaphore, #tpu.memory_space<semaphore_mem>>
    tpu.enqueue_dma source(%38 : memref<1x128xf32, #tpu.memory_space<any>>) target(%39 : memref<1x128xf32, #tpu.memory_space<vmem>>) target_semaphore(%41 : memref<!tpu.dma_semaphore, #tpu.memory_space<semaphore_mem>>)
    %c6 = arith.constant 6 : index
    %42 = memref.load %arg0[%c6] : memref<16xi32, #tpu.memory_space<smem>>
    %c0_i32_29 = arith.constant 0 : i32
    %43 = arith.maxsi %42, %c0_i32_29 : i32
    %c511_i32_30 = arith.constant 511 : i32
    %44 = arith.minsi %43, %c511_i32_30 : i32
    %c6_i32 = arith.constant 6 : i32
    %c0_i32_31 = arith.constant 0 : i32
    %45 = tpu.memref_slice %arg1[%44, %c0_i32_31] : memref<512x128xf32, #tpu.memory_space<any>> -> memref<1x128xf32, #tpu.memory_space<any>>
    %c6_i32_32 = arith.constant 6 : i32
    %c0_i32_33 = arith.constant 0 : i32
    %46 = tpu.memref_slice %arg3[%c6_i32_32, %c0_i32_33] : memref<16x128xf32, #tpu.memory_space<vmem>> -> memref<1x128xf32, #tpu.memory_space<vmem>>
    %47 = tpu.memref_slice %arg4[%c6_i32] : memref<16x!tpu.dma_semaphore, #tpu.memory_space<semaphore_mem>> -> memref<1x!tpu.dma_semaphore, #tpu.memory_space<semaphore_mem>>
    %48 = tpu.memref_squeeze %47 : memref<1x!tpu.dma_semaphore, #tpu.memory_space<semaphore_mem>> -> memref<!tpu.dma_semaphore, #tpu.memory_space<semaphore_mem>>
    tpu.enqueue_dma source(%45 : memref<1x128xf32, #tpu.memory_space<any>>) target(%46 : memref<1x128xf32, #tpu.memory_space<vmem>>) target_semaphore(%48 : memref<!tpu.dma_semaphore, #tpu.memory_space<semaphore_mem>>)
    %c7 = arith.constant 7 : index
    %49 = memref.load %arg0[%c7] : memref<16xi32, #tpu.memory_space<smem>>
    %c0_i32_34 = arith.constant 0 : i32
    %50 = arith.maxsi %49, %c0_i32_34 : i32
    %c511_i32_35 = arith.constant 511 : i32
    %51 = arith.minsi %50, %c511_i32_35 : i32
    %c7_i32 = arith.constant 7 : i32
    %c0_i32_36 = arith.constant 0 : i32
    %52 = tpu.memref_slice %arg1[%51, %c0_i32_36] : memref<512x128xf32, #tpu.memory_space<any>> -> memref<1x128xf32, #tpu.memory_space<any>>
    %c7_i32_37 = arith.constant 7 : i32
    %c0_i32_38 = arith.constant 0 : i32
    %53 = tpu.memref_slice %arg3[%c7_i32_37, %c0_i32_38] : memref<16x128xf32, #tpu.memory_space<vmem>> -> memref<1x128xf32, #tpu.memory_space<vmem>>
    %54 = tpu.memref_slice %arg4[%c7_i32] : memref<16x!tpu.dma_semaphore, #tpu.memory_space<semaphore_mem>> -> memref<1x!tpu.dma_semaphore, #tpu.memory_space<semaphore_mem>>
    %55 = tpu.memref_squeeze %54 : memref<1x!tpu.dma_semaphore, #tpu.memory_space<semaphore_mem>> -> memref<!tpu.dma_semaphore, #tpu.memory_space<semaphore_mem>>
    tpu.enqueue_dma source(%52 : memref<1x128xf32, #tpu.memory_space<any>>) target(%53 : memref<1x128xf32, #tpu.memory_space<vmem>>) target_semaphore(%55 : memref<!tpu.dma_semaphore, #tpu.memory_space<semaphore_mem>>)
    %c8 = arith.constant 8 : index
    %56 = memref.load %arg0[%c8] : memref<16xi32, #tpu.memory_space<smem>>
    %c0_i32_39 = arith.constant 0 : i32
    %57 = arith.maxsi %56, %c0_i32_39 : i32
    %c511_i32_40 = arith.constant 511 : i32
    %58 = arith.minsi %57, %c511_i32_40 : i32
    %c8_i32 = arith.constant 8 : i32
    %c0_i32_41 = arith.constant 0 : i32
    %59 = tpu.memref_slice %arg1[%58, %c0_i32_41] : memref<512x128xf32, #tpu.memory_space<any>> -> memref<1x128xf32, #tpu.memory_space<any>>
    %c8_i32_42 = arith.constant 8 : i32
    %c0_i32_43 = arith.constant 0 : i32
    %60 = tpu.memref_slice %arg3[%c8_i32_42, %c0_i32_43] : memref<16x128xf32, #tpu.memory_space<vmem>> -> memref<1x128xf32, #tpu.memory_space<vmem>>
    %61 = tpu.memref_slice %arg4[%c8_i32] : memref<16x!tpu.dma_semaphore, #tpu.memory_space<semaphore_mem>> -> memref<1x!tpu.dma_semaphore, #tpu.memory_space<semaphore_mem>>
    %62 = tpu.memref_squeeze %61 : memref<1x!tpu.dma_semaphore, #tpu.memory_space<semaphore_mem>> -> memref<!tpu.dma_semaphore, #tpu.memory_space<semaphore_mem>>
    tpu.enqueue_dma source(%59 : memref<1x128xf32, #tpu.memory_space<any>>) target(%60 : memref<1x128xf32, #tpu.memory_space<vmem>>) target_semaphore(%62 : memref<!tpu.dma_semaphore, #tpu.memory_space<semaphore_mem>>)
    %c9 = arith.constant 9 : index
    %63 = memref.load %arg0[%c9] : memref<16xi32, #tpu.memory_space<smem>>
    %c0_i32_44 = arith.constant 0 : i32
    %64 = arith.maxsi %63, %c0_i32_44 : i32
    %c511_i32_45 = arith.constant 511 : i32
    %65 = arith.minsi %64, %c511_i32_45 : i32
    %c9_i32 = arith.constant 9 : i32
    %c0_i32_46 = arith.constant 0 : i32
    %66 = tpu.memref_slice %arg1[%65, %c0_i32_46] : memref<512x128xf32, #tpu.memory_space<any>> -> memref<1x128xf32, #tpu.memory_space<any>>
    %c9_i32_47 = arith.constant 9 : i32
    %c0_i32_48 = arith.constant 0 : i32
    %67 = tpu.memref_slice %arg3[%c9_i32_47, %c0_i32_48] : memref<16x128xf32, #tpu.memory_space<vmem>> -> memref<1x128xf32, #tpu.memory_space<vmem>>
    %68 = tpu.memref_slice %arg4[%c9_i32] : memref<16x!tpu.dma_semaphore, #tpu.memory_space<semaphore_mem>> -> memref<1x!tpu.dma_semaphore, #tpu.memory_space<semaphore_mem>>
    %69 = tpu.memref_squeeze %68 : memref<1x!tpu.dma_semaphore, #tpu.memory_space<semaphore_mem>> -> memref<!tpu.dma_semaphore, #tpu.memory_space<semaphore_mem>>
    tpu.enqueue_dma source(%66 : memref<1x128xf32, #tpu.memory_space<any>>) target(%67 : memref<1x128xf32, #tpu.memory_space<vmem>>) target_semaphore(%69 : memref<!tpu.dma_semaphore, #tpu.memory_space<semaphore_mem>>)
    %c10 = arith.constant 10 : index
    %70 = memref.load %arg0[%c10] : memref<16xi32, #tpu.memory_space<smem>>
    %c0_i32_49 = arith.constant 0 : i32
    %71 = arith.maxsi %70, %c0_i32_49 : i32
    %c511_i32_50 = arith.constant 511 : i32
    %72 = arith.minsi %71, %c511_i32_50 : i32
    %c10_i32 = arith.constant 10 : i32
    %c0_i32_51 = arith.constant 0 : i32
    %73 = tpu.memref_slice %arg1[%72, %c0_i32_51] : memref<512x128xf32, #tpu.memory_space<any>> -> memref<1x128xf32, #tpu.memory_space<any>>
    %c10_i32_52 = arith.constant 10 : i32
    %c0_i32_53 = arith.constant 0 : i32
    %74 = tpu.memref_slice %arg3[%c10_i32_52, %c0_i32_53] : memref<16x128xf32, #tpu.memory_space<vmem>> -> memref<1x128xf32, #tpu.memory_space<vmem>>
    %75 = tpu.memref_slice %arg4[%c10_i32] : memref<16x!tpu.dma_semaphore, #tpu.memory_space<semaphore_mem>> -> memref<1x!tpu.dma_semaphore, #tpu.memory_space<semaphore_mem>>
    %76 = tpu.memref_squeeze %75 : memref<1x!tpu.dma_semaphore, #tpu.memory_space<semaphore_mem>> -> memref<!tpu.dma_semaphore, #tpu.memory_space<semaphore_mem>>
    tpu.enqueue_dma source(%73 : memref<1x128xf32, #tpu.memory_space<any>>) target(%74 : memref<1x128xf32, #tpu.memory_space<vmem>>) target_semaphore(%76 : memref<!tpu.dma_semaphore, #tpu.memory_space<semaphore_mem>>)
    %c11 = arith.constant 11 : index
    %77 = memref.load %arg0[%c11] : memref<16xi32, #tpu.memory_space<smem>>
    %c0_i32_54 = arith.constant 0 : i32
    %78 = arith.maxsi %77, %c0_i32_54 : i32
    %c511_i32_55 = arith.constant 511 : i32
    %79 = arith.minsi %78, %c511_i32_55 : i32
    %c11_i32 = arith.constant 11 : i32
    %c0_i32_56 = arith.constant 0 : i32
    %80 = tpu.memref_slice %arg1[%79, %c0_i32_56] : memref<512x128xf32, #tpu.memory_space<any>> -> memref<1x128xf32, #tpu.memory_space<any>>
    %c11_i32_57 = arith.constant 11 : i32
    %c0_i32_58 = arith.constant 0 : i32
    %81 = tpu.memref_slice %arg3[%c11_i32_57, %c0_i32_58] : memref<16x128xf32, #tpu.memory_space<vmem>> -> memref<1x128xf32, #tpu.memory_space<vmem>>
    %82 = tpu.memref_slice %arg4[%c11_i32] : memref<16x!tpu.dma_semaphore, #tpu.memory_space<semaphore_mem>> -> memref<1x!tpu.dma_semaphore, #tpu.memory_space<semaphore_mem>>
    %83 = tpu.memref_squeeze %82 : memref<1x!tpu.dma_semaphore, #tpu.memory_space<semaphore_mem>> -> memref<!tpu.dma_semaphore, #tpu.memory_space<semaphore_mem>>
    tpu.enqueue_dma source(%80 : memref<1x128xf32, #tpu.memory_space<any>>) target(%81 : memref<1x128xf32, #tpu.memory_space<vmem>>) target_semaphore(%83 : memref<!tpu.dma_semaphore, #tpu.memory_space<semaphore_mem>>)
    %c12 = arith.constant 12 : index
    %84 = memref.load %arg0[%c12] : memref<16xi32, #tpu.memory_space<smem>>
    %c0_i32_59 = arith.constant 0 : i32
    %85 = arith.maxsi %84, %c0_i32_59 : i32
    %c511_i32_60 = arith.constant 511 : i32
    %86 = arith.minsi %85, %c511_i32_60 : i32
    %c12_i32 = arith.constant 12 : i32
    %c0_i32_61 = arith.constant 0 : i32
    %87 = tpu.memref_slice %arg1[%86, %c0_i32_61] : memref<512x128xf32, #tpu.memory_space<any>> -> memref<1x128xf32, #tpu.memory_space<any>>
    %c12_i32_62 = arith.constant 12 : i32
    %c0_i32_63 = arith.constant 0 : i32
    %88 = tpu.memref_slice %arg3[%c12_i32_62, %c0_i32_63] : memref<16x128xf32, #tpu.memory_space<vmem>> -> memref<1x128xf32, #tpu.memory_space<vmem>>
    %89 = tpu.memref_slice %arg4[%c12_i32] : memref<16x!tpu.dma_semaphore, #tpu.memory_space<semaphore_mem>> -> memref<1x!tpu.dma_semaphore, #tpu.memory_space<semaphore_mem>>
    %90 = tpu.memref_squeeze %89 : memref<1x!tpu.dma_semaphore, #tpu.memory_space<semaphore_mem>> -> memref<!tpu.dma_semaphore, #tpu.memory_space<semaphore_mem>>
    tpu.enqueue_dma source(%87 : memref<1x128xf32, #tpu.memory_space<any>>) target(%88 : memref<1x128xf32, #tpu.memory_space<vmem>>) target_semaphore(%90 : memref<!tpu.dma_semaphore, #tpu.memory_space<semaphore_mem>>)
    %c13 = arith.constant 13 : index
    %91 = memref.load %arg0[%c13] : memref<16xi32, #tpu.memory_space<smem>>
    %c0_i32_64 = arith.constant 0 : i32
    %92 = arith.maxsi %91, %c0_i32_64 : i32
    %c511_i32_65 = arith.constant 511 : i32
    %93 = arith.minsi %92, %c511_i32_65 : i32
    %c13_i32 = arith.constant 13 : i32
    %c0_i32_66 = arith.constant 0 : i32
    %94 = tpu.memref_slice %arg1[%93, %c0_i32_66] : memref<512x128xf32, #tpu.memory_space<any>> -> memref<1x128xf32, #tpu.memory_space<any>>
    %c13_i32_67 = arith.constant 13 : i32
    %c0_i32_68 = arith.constant 0 : i32
    %95 = tpu.memref_slice %arg3[%c13_i32_67, %c0_i32_68] : memref<16x128xf32, #tpu.memory_space<vmem>> -> memref<1x128xf32, #tpu.memory_space<vmem>>
    %96 = tpu.memref_slice %arg4[%c13_i32] : memref<16x!tpu.dma_semaphore, #tpu.memory_space<semaphore_mem>> -> memref<1x!tpu.dma_semaphore, #tpu.memory_space<semaphore_mem>>
    %97 = tpu.memref_squeeze %96 : memref<1x!tpu.dma_semaphore, #tpu.memory_space<semaphore_mem>> -> memref<!tpu.dma_semaphore, #tpu.memory_space<semaphore_mem>>
    tpu.enqueue_dma source(%94 : memref<1x128xf32, #tpu.memory_space<any>>) target(%95 : memref<1x128xf32, #tpu.memory_space<vmem>>) target_semaphore(%97 : memref<!tpu.dma_semaphore, #tpu.memory_space<semaphore_mem>>)
    %c14 = arith.constant 14 : index
    %98 = memref.load %arg0[%c14] : memref<16xi32, #tpu.memory_space<smem>>
    %c0_i32_69 = arith.constant 0 : i32
    %99 = arith.maxsi %98, %c0_i32_69 : i32
    %c511_i32_70 = arith.constant 511 : i32
    %100 = arith.minsi %99, %c511_i32_70 : i32
    %c14_i32 = arith.constant 14 : i32
    %c0_i32_71 = arith.constant 0 : i32
    %101 = tpu.memref_slice %arg1[%100, %c0_i32_71] : memref<512x128xf32, #tpu.memory_space<any>> -> memref<1x128xf32, #tpu.memory_space<any>>
    %c14_i32_72 = arith.constant 14 : i32
    %c0_i32_73 = arith.constant 0 : i32
    %102 = tpu.memref_slice %arg3[%c14_i32_72, %c0_i32_73] : memref<16x128xf32, #tpu.memory_space<vmem>> -> memref<1x128xf32, #tpu.memory_space<vmem>>
    %103 = tpu.memref_slice %arg4[%c14_i32] : memref<16x!tpu.dma_semaphore, #tpu.memory_space<semaphore_mem>> -> memref<1x!tpu.dma_semaphore, #tpu.memory_space<semaphore_mem>>
    %104 = tpu.memref_squeeze %103 : memref<1x!tpu.dma_semaphore, #tpu.memory_space<semaphore_mem>> -> memref<!tpu.dma_semaphore, #tpu.memory_space<semaphore_mem>>
    tpu.enqueue_dma source(%101 : memref<1x128xf32, #tpu.memory_space<any>>) target(%102 : memref<1x128xf32, #tpu.memory_space<vmem>>) target_semaphore(%104 : memref<!tpu.dma_semaphore, #tpu.memory_space<semaphore_mem>>)
    %c15 = arith.constant 15 : index
    %105 = memref.load %arg0[%c15] : memref<16xi32, #tpu.memory_space<smem>>
    %c0_i32_74 = arith.constant 0 : i32
    %106 = arith.maxsi %105, %c0_i32_74 : i32
    %c511_i32_75 = arith.constant 511 : i32
    %107 = arith.minsi %106, %c511_i32_75 : i32
    %c15_i32 = arith.constant 15 : i32
    %c0_i32_76 = arith.constant 0 : i32
    %108 = tpu.memref_slice %arg1[%107, %c0_i32_76] : memref<512x128xf32, #tpu.memory_space<any>> -> memref<1x128xf32, #tpu.memory_space<any>>
    %c15_i32_77 = arith.constant 15 : i32
    %c0_i32_78 = arith.constant 0 : i32
    %109 = tpu.memref_slice %arg3[%c15_i32_77, %c0_i32_78] : memref<16x128xf32, #tpu.memory_space<vmem>> -> memref<1x128xf32, #tpu.memory_space<vmem>>
    %110 = tpu.memref_slice %arg4[%c15_i32] : memref<16x!tpu.dma_semaphore, #tpu.memory_space<semaphore_mem>> -> memref<1x!tpu.dma_semaphore, #tpu.memory_space<semaphore_mem>>
    %111 = tpu.memref_squeeze %110 : memref<1x!tpu.dma_semaphore, #tpu.memory_space<semaphore_mem>> -> memref<!tpu.dma_semaphore, #tpu.memory_space<semaphore_mem>>
    tpu.enqueue_dma source(%108 : memref<1x128xf32, #tpu.memory_space<any>>) target(%109 : memref<1x128xf32, #tpu.memory_space<vmem>>) target_semaphore(%111 : memref<!tpu.dma_semaphore, #tpu.memory_space<semaphore_mem>>)
    %c0_i32_79 = arith.constant 0 : i32
    %c0_i32_80 = arith.constant 0 : i32
    %c0_i32_81 = arith.constant 0 : i32
    %112 = tpu.memref_slice %arg1[%c0_i32_80, %c0_i32_81] : memref<512x128xf32, #tpu.memory_space<any>> -> memref<1x128xf32, #tpu.memory_space<any>>
    %c0_i32_82 = arith.constant 0 : i32
    %c0_i32_83 = arith.constant 0 : i32
    %113 = tpu.memref_slice %arg3[%c0_i32_82, %c0_i32_83] : memref<16x128xf32, #tpu.memory_space<vmem>> -> memref<1x128xf32, #tpu.memory_space<vmem>>
    %114 = tpu.memref_slice %arg4[%c0_i32_79] : memref<16x!tpu.dma_semaphore, #tpu.memory_space<semaphore_mem>> -> memref<1x!tpu.dma_semaphore, #tpu.memory_space<semaphore_mem>>
    %115 = tpu.memref_squeeze %114 : memref<1x!tpu.dma_semaphore, #tpu.memory_space<semaphore_mem>> -> memref<!tpu.dma_semaphore, #tpu.memory_space<semaphore_mem>>
    tpu.wait_dma2 semaphore(%115 : memref<!tpu.dma_semaphore, #tpu.memory_space<semaphore_mem>>) src(%112 : memref<1x128xf32, #tpu.memory_space<any>>) dst(%113 : memref<1x128xf32, #tpu.memory_space<vmem>>)
    %c1_i32_84 = arith.constant 1 : i32
    %c0_i32_85 = arith.constant 0 : i32
    %c0_i32_86 = arith.constant 0 : i32
    %116 = tpu.memref_slice %arg1[%c0_i32_85, %c0_i32_86] : memref<512x128xf32, #tpu.memory_space<any>> -> memref<1x128xf32, #tpu.memory_space<any>>
    %c1_i32_87 = arith.constant 1 : i32
    %c0_i32_88 = arith.constant 0 : i32
    %117 = tpu.memref_slice %arg3[%c1_i32_87, %c0_i32_88] : memref<16x128xf32, #tpu.memory_space<vmem>> -> memref<1x128xf32, #tpu.memory_space<vmem>>
    %118 = tpu.memref_slice %arg4[%c1_i32_84] : memref<16x!tpu.dma_semaphore, #tpu.memory_space<semaphore_mem>> -> memref<1x!tpu.dma_semaphore, #tpu.memory_space<semaphore_mem>>
    %119 = tpu.memref_squeeze %118 : memref<1x!tpu.dma_semaphore, #tpu.memory_space<semaphore_mem>> -> memref<!tpu.dma_semaphore, #tpu.memory_space<semaphore_mem>>
    tpu.wait_dma2 semaphore(%119 : memref<!tpu.dma_semaphore, #tpu.memory_space<semaphore_mem>>) src(%116 : memref<1x128xf32, #tpu.memory_space<any>>) dst(%117 : memref<1x128xf32, #tpu.memory_space<vmem>>)
    %c2_i32_89 = arith.constant 2 : i32
    %c0_i32_90 = arith.constant 0 : i32
    %c0_i32_91 = arith.constant 0 : i32
    %120 = tpu.memref_slice %arg1[%c0_i32_90, %c0_i32_91] : memref<512x128xf32, #tpu.memory_space<any>> -> memref<1x128xf32, #tpu.memory_space<any>>
    %c2_i32_92 = arith.constant 2 : i32
    %c0_i32_93 = arith.constant 0 : i32
    %121 = tpu.memref_slice %arg3[%c2_i32_92, %c0_i32_93] : memref<16x128xf32, #tpu.memory_space<vmem>> -> memref<1x128xf32, #tpu.memory_space<vmem>>
    %122 = tpu.memref_slice %arg4[%c2_i32_89] : memref<16x!tpu.dma_semaphore, #tpu.memory_space<semaphore_mem>> -> memref<1x!tpu.dma_semaphore, #tpu.memory_space<semaphore_mem>>
    %123 = tpu.memref_squeeze %122 : memref<1x!tpu.dma_semaphore, #tpu.memory_space<semaphore_mem>> -> memref<!tpu.dma_semaphore, #tpu.memory_space<semaphore_mem>>
    tpu.wait_dma2 semaphore(%123 : memref<!tpu.dma_semaphore, #tpu.memory_space<semaphore_mem>>) src(%120 : memref<1x128xf32, #tpu.memory_space<any>>) dst(%121 : memref<1x128xf32, #tpu.memory_space<vmem>>)
    %c3_i32_94 = arith.constant 3 : i32
    %c0_i32_95 = arith.constant 0 : i32
    %c0_i32_96 = arith.constant 0 : i32
    %124 = tpu.memref_slice %arg1[%c0_i32_95, %c0_i32_96] : memref<512x128xf32, #tpu.memory_space<any>> -> memref<1x128xf32, #tpu.memory_space<any>>
    %c3_i32_97 = arith.constant 3 : i32
    %c0_i32_98 = arith.constant 0 : i32
    %125 = tpu.memref_slice %arg3[%c3_i32_97, %c0_i32_98] : memref<16x128xf32, #tpu.memory_space<vmem>> -> memref<1x128xf32, #tpu.memory_space<vmem>>
    %126 = tpu.memref_slice %arg4[%c3_i32_94] : memref<16x!tpu.dma_semaphore, #tpu.memory_space<semaphore_mem>> -> memref<1x!tpu.dma_semaphore, #tpu.memory_space<semaphore_mem>>
    %127 = tpu.memref_squeeze %126 : memref<1x!tpu.dma_semaphore, #tpu.memory_space<semaphore_mem>> -> memref<!tpu.dma_semaphore, #tpu.memory_space<semaphore_mem>>
    tpu.wait_dma2 semaphore(%127 : memref<!tpu.dma_semaphore, #tpu.memory_space<semaphore_mem>>) src(%124 : memref<1x128xf32, #tpu.memory_space<any>>) dst(%125 : memref<1x128xf32, #tpu.memory_space<vmem>>)
    %c4_i32_99 = arith.constant 4 : i32
    %c0_i32_100 = arith.constant 0 : i32
    %c0_i32_101 = arith.constant 0 : i32
    %128 = tpu.memref_slice %arg1[%c0_i32_100, %c0_i32_101] : memref<512x128xf32, #tpu.memory_space<any>> -> memref<1x128xf32, #tpu.memory_space<any>>
    %c4_i32_102 = arith.constant 4 : i32
    %c0_i32_103 = arith.constant 0 : i32
    %129 = tpu.memref_slice %arg3[%c4_i32_102, %c0_i32_103] : memref<16x128xf32, #tpu.memory_space<vmem>> -> memref<1x128xf32, #tpu.memory_space<vmem>>
    %130 = tpu.memref_slice %arg4[%c4_i32_99] : memref<16x!tpu.dma_semaphore, #tpu.memory_space<semaphore_mem>> -> memref<1x!tpu.dma_semaphore, #tpu.memory_space<semaphore_mem>>
    %131 = tpu.memref_squeeze %130 : memref<1x!tpu.dma_semaphore, #tpu.memory_space<semaphore_mem>> -> memref<!tpu.dma_semaphore, #tpu.memory_space<semaphore_mem>>
    tpu.wait_dma2 semaphore(%131 : memref<!tpu.dma_semaphore, #tpu.memory_space<semaphore_mem>>) src(%128 : memref<1x128xf32, #tpu.memory_space<any>>) dst(%129 : memref<1x128xf32, #tpu.memory_space<vmem>>)
    %c5_i32_104 = arith.constant 5 : i32
    %c0_i32_105 = arith.constant 0 : i32
    %c0_i32_106 = arith.constant 0 : i32
    %132 = tpu.memref_slice %arg1[%c0_i32_105, %c0_i32_106] : memref<512x128xf32, #tpu.memory_space<any>> -> memref<1x128xf32, #tpu.memory_space<any>>
    %c5_i32_107 = arith.constant 5 : i32
    %c0_i32_108 = arith.constant 0 : i32
    %133 = tpu.memref_slice %arg3[%c5_i32_107, %c0_i32_108] : memref<16x128xf32, #tpu.memory_space<vmem>> -> memref<1x128xf32, #tpu.memory_space<vmem>>
    %134 = tpu.memref_slice %arg4[%c5_i32_104] : memref<16x!tpu.dma_semaphore, #tpu.memory_space<semaphore_mem>> -> memref<1x!tpu.dma_semaphore, #tpu.memory_space<semaphore_mem>>
    %135 = tpu.memref_squeeze %134 : memref<1x!tpu.dma_semaphore, #tpu.memory_space<semaphore_mem>> -> memref<!tpu.dma_semaphore, #tpu.memory_space<semaphore_mem>>
    tpu.wait_dma2 semaphore(%135 : memref<!tpu.dma_semaphore, #tpu.memory_space<semaphore_mem>>) src(%132 : memref<1x128xf32, #tpu.memory_space<any>>) dst(%133 : memref<1x128xf32, #tpu.memory_space<vmem>>)
    %c6_i32_109 = arith.constant 6 : i32
    %c0_i32_110 = arith.constant 0 : i32
    %c0_i32_111 = arith.constant 0 : i32
    %136 = tpu.memref_slice %arg1[%c0_i32_110, %c0_i32_111] : memref<512x128xf32, #tpu.memory_space<any>> -> memref<1x128xf32, #tpu.memory_space<any>>
    %c6_i32_112 = arith.constant 6 : i32
    %c0_i32_113 = arith.constant 0 : i32
    %137 = tpu.memref_slice %arg3[%c6_i32_112, %c0_i32_113] : memref<16x128xf32, #tpu.memory_space<vmem>> -> memref<1x128xf32, #tpu.memory_space<vmem>>
    %138 = tpu.memref_slice %arg4[%c6_i32_109] : memref<16x!tpu.dma_semaphore, #tpu.memory_space<semaphore_mem>> -> memref<1x!tpu.dma_semaphore, #tpu.memory_space<semaphore_mem>>
    %139 = tpu.memref_squeeze %138 : memref<1x!tpu.dma_semaphore, #tpu.memory_space<semaphore_mem>> -> memref<!tpu.dma_semaphore, #tpu.memory_space<semaphore_mem>>
    tpu.wait_dma2 semaphore(%139 : memref<!tpu.dma_semaphore, #tpu.memory_space<semaphore_mem>>) src(%136 : memref<1x128xf32, #tpu.memory_space<any>>) dst(%137 : memref<1x128xf32, #tpu.memory_space<vmem>>)
    %c7_i32_114 = arith.constant 7 : i32
    %c0_i32_115 = arith.constant 0 : i32
    %c0_i32_116 = arith.constant 0 : i32
    %140 = tpu.memref_slice %arg1[%c0_i32_115, %c0_i32_116] : memref<512x128xf32, #tpu.memory_space<any>> -> memref<1x128xf32, #tpu.memory_space<any>>
    %c7_i32_117 = arith.constant 7 : i32
    %c0_i32_118 = arith.constant 0 : i32
    %141 = tpu.memref_slice %arg3[%c7_i32_117, %c0_i32_118] : memref<16x128xf32, #tpu.memory_space<vmem>> -> memref<1x128xf32, #tpu.memory_space<vmem>>
    %142 = tpu.memref_slice %arg4[%c7_i32_114] : memref<16x!tpu.dma_semaphore, #tpu.memory_space<semaphore_mem>> -> memref<1x!tpu.dma_semaphore, #tpu.memory_space<semaphore_mem>>
    %143 = tpu.memref_squeeze %142 : memref<1x!tpu.dma_semaphore, #tpu.memory_space<semaphore_mem>> -> memref<!tpu.dma_semaphore, #tpu.memory_space<semaphore_mem>>
    tpu.wait_dma2 semaphore(%143 : memref<!tpu.dma_semaphore, #tpu.memory_space<semaphore_mem>>) src(%140 : memref<1x128xf32, #tpu.memory_space<any>>) dst(%141 : memref<1x128xf32, #tpu.memory_space<vmem>>)
    %c8_i32_119 = arith.constant 8 : i32
    %c0_i32_120 = arith.constant 0 : i32
    %c0_i32_121 = arith.constant 0 : i32
    %144 = tpu.memref_slice %arg1[%c0_i32_120, %c0_i32_121] : memref<512x128xf32, #tpu.memory_space<any>> -> memref<1x128xf32, #tpu.memory_space<any>>
    %c8_i32_122 = arith.constant 8 : i32
    %c0_i32_123 = arith.constant 0 : i32
    %145 = tpu.memref_slice %arg3[%c8_i32_122, %c0_i32_123] : memref<16x128xf32, #tpu.memory_space<vmem>> -> memref<1x128xf32, #tpu.memory_space<vmem>>
    %146 = tpu.memref_slice %arg4[%c8_i32_119] : memref<16x!tpu.dma_semaphore, #tpu.memory_space<semaphore_mem>> -> memref<1x!tpu.dma_semaphore, #tpu.memory_space<semaphore_mem>>
    %147 = tpu.memref_squeeze %146 : memref<1x!tpu.dma_semaphore, #tpu.memory_space<semaphore_mem>> -> memref<!tpu.dma_semaphore, #tpu.memory_space<semaphore_mem>>
    tpu.wait_dma2 semaphore(%147 : memref<!tpu.dma_semaphore, #tpu.memory_space<semaphore_mem>>) src(%144 : memref<1x128xf32, #tpu.memory_space<any>>) dst(%145 : memref<1x128xf32, #tpu.memory_space<vmem>>)
    %c9_i32_124 = arith.constant 9 : i32
    %c0_i32_125 = arith.constant 0 : i32
    %c0_i32_126 = arith.constant 0 : i32
    %148 = tpu.memref_slice %arg1[%c0_i32_125, %c0_i32_126] : memref<512x128xf32, #tpu.memory_space<any>> -> memref<1x128xf32, #tpu.memory_space<any>>
    %c9_i32_127 = arith.constant 9 : i32
    %c0_i32_128 = arith.constant 0 : i32
    %149 = tpu.memref_slice %arg3[%c9_i32_127, %c0_i32_128] : memref<16x128xf32, #tpu.memory_space<vmem>> -> memref<1x128xf32, #tpu.memory_space<vmem>>
    %150 = tpu.memref_slice %arg4[%c9_i32_124] : memref<16x!tpu.dma_semaphore, #tpu.memory_space<semaphore_mem>> -> memref<1x!tpu.dma_semaphore, #tpu.memory_space<semaphore_mem>>
    %151 = tpu.memref_squeeze %150 : memref<1x!tpu.dma_semaphore, #tpu.memory_space<semaphore_mem>> -> memref<!tpu.dma_semaphore, #tpu.memory_space<semaphore_mem>>
    tpu.wait_dma2 semaphore(%151 : memref<!tpu.dma_semaphore, #tpu.memory_space<semaphore_mem>>) src(%148 : memref<1x128xf32, #tpu.memory_space<any>>) dst(%149 : memref<1x128xf32, #tpu.memory_space<vmem>>)
    %c10_i32_129 = arith.constant 10 : i32
    %c0_i32_130 = arith.constant 0 : i32
    %c0_i32_131 = arith.constant 0 : i32
    %152 = tpu.memref_slice %arg1[%c0_i32_130, %c0_i32_131] : memref<512x128xf32, #tpu.memory_space<any>> -> memref<1x128xf32, #tpu.memory_space<any>>
    %c10_i32_132 = arith.constant 10 : i32
    %c0_i32_133 = arith.constant 0 : i32
    %153 = tpu.memref_slice %arg3[%c10_i32_132, %c0_i32_133] : memref<16x128xf32, #tpu.memory_space<vmem>> -> memref<1x128xf32, #tpu.memory_space<vmem>>
    %154 = tpu.memref_slice %arg4[%c10_i32_129] : memref<16x!tpu.dma_semaphore, #tpu.memory_space<semaphore_mem>> -> memref<1x!tpu.dma_semaphore, #tpu.memory_space<semaphore_mem>>
    %155 = tpu.memref_squeeze %154 : memref<1x!tpu.dma_semaphore, #tpu.memory_space<semaphore_mem>> -> memref<!tpu.dma_semaphore, #tpu.memory_space<semaphore_mem>>
    tpu.wait_dma2 semaphore(%155 : memref<!tpu.dma_semaphore, #tpu.memory_space<semaphore_mem>>) src(%152 : memref<1x128xf32, #tpu.memory_space<any>>) dst(%153 : memref<1x128xf32, #tpu.memory_space<vmem>>)
    %c11_i32_134 = arith.constant 11 : i32
    %c0_i32_135 = arith.constant 0 : i32
    %c0_i32_136 = arith.constant 0 : i32
    %156 = tpu.memref_slice %arg1[%c0_i32_135, %c0_i32_136] : memref<512x128xf32, #tpu.memory_space<any>> -> memref<1x128xf32, #tpu.memory_space<any>>
    %c11_i32_137 = arith.constant 11 : i32
    %c0_i32_138 = arith.constant 0 : i32
    %157 = tpu.memref_slice %arg3[%c11_i32_137, %c0_i32_138] : memref<16x128xf32, #tpu.memory_space<vmem>> -> memref<1x128xf32, #tpu.memory_space<vmem>>
    %158 = tpu.memref_slice %arg4[%c11_i32_134] : memref<16x!tpu.dma_semaphore, #tpu.memory_space<semaphore_mem>> -> memref<1x!tpu.dma_semaphore, #tpu.memory_space<semaphore_mem>>
    %159 = tpu.memref_squeeze %158 : memref<1x!tpu.dma_semaphore, #tpu.memory_space<semaphore_mem>> -> memref<!tpu.dma_semaphore, #tpu.memory_space<semaphore_mem>>
    tpu.wait_dma2 semaphore(%159 : memref<!tpu.dma_semaphore, #tpu.memory_space<semaphore_mem>>) src(%156 : memref<1x128xf32, #tpu.memory_space<any>>) dst(%157 : memref<1x128xf32, #tpu.memory_space<vmem>>)
    %c12_i32_139 = arith.constant 12 : i32
    %c0_i32_140 = arith.constant 0 : i32
    %c0_i32_141 = arith.constant 0 : i32
    %160 = tpu.memref_slice %arg1[%c0_i32_140, %c0_i32_141] : memref<512x128xf32, #tpu.memory_space<any>> -> memref<1x128xf32, #tpu.memory_space<any>>
    %c12_i32_142 = arith.constant 12 : i32
    %c0_i32_143 = arith.constant 0 : i32
    %161 = tpu.memref_slice %arg3[%c12_i32_142, %c0_i32_143] : memref<16x128xf32, #tpu.memory_space<vmem>> -> memref<1x128xf32, #tpu.memory_space<vmem>>
    %162 = tpu.memref_slice %arg4[%c12_i32_139] : memref<16x!tpu.dma_semaphore, #tpu.memory_space<semaphore_mem>> -> memref<1x!tpu.dma_semaphore, #tpu.memory_space<semaphore_mem>>
    %163 = tpu.memref_squeeze %162 : memref<1x!tpu.dma_semaphore, #tpu.memory_space<semaphore_mem>> -> memref<!tpu.dma_semaphore, #tpu.memory_space<semaphore_mem>>
    tpu.wait_dma2 semaphore(%163 : memref<!tpu.dma_semaphore, #tpu.memory_space<semaphore_mem>>) src(%160 : memref<1x128xf32, #tpu.memory_space<any>>) dst(%161 : memref<1x128xf32, #tpu.memory_space<vmem>>)
    %c13_i32_144 = arith.constant 13 : i32
    %c0_i32_145 = arith.constant 0 : i32
    %c0_i32_146 = arith.constant 0 : i32
    %164 = tpu.memref_slice %arg1[%c0_i32_145, %c0_i32_146] : memref<512x128xf32, #tpu.memory_space<any>> -> memref<1x128xf32, #tpu.memory_space<any>>
    %c13_i32_147 = arith.constant 13 : i32
    %c0_i32_148 = arith.constant 0 : i32
    %165 = tpu.memref_slice %arg3[%c13_i32_147, %c0_i32_148] : memref<16x128xf32, #tpu.memory_space<vmem>> -> memref<1x128xf32, #tpu.memory_space<vmem>>
    %166 = tpu.memref_slice %arg4[%c13_i32_144] : memref<16x!tpu.dma_semaphore, #tpu.memory_space<semaphore_mem>> -> memref<1x!tpu.dma_semaphore, #tpu.memory_space<semaphore_mem>>
    %167 = tpu.memref_squeeze %166 : memref<1x!tpu.dma_semaphore, #tpu.memory_space<semaphore_mem>> -> memref<!tpu.dma_semaphore, #tpu.memory_space<semaphore_mem>>
    tpu.wait_dma2 semaphore(%167 : memref<!tpu.dma_semaphore, #tpu.memory_space<semaphore_mem>>) src(%164 : memref<1x128xf32, #tpu.memory_space<any>>) dst(%165 : memref<1x128xf32, #tpu.memory_space<vmem>>)
    %c14_i32_149 = arith.constant 14 : i32
    %c0_i32_150 = arith.constant 0 : i32
    %c0_i32_151 = arith.constant 0 : i32
    %168 = tpu.memref_slice %arg1[%c0_i32_150, %c0_i32_151] : memref<512x128xf32, #tpu.memory_space<any>> -> memref<1x128xf32, #tpu.memory_space<any>>
    %c14_i32_152 = arith.constant 14 : i32
    %c0_i32_153 = arith.constant 0 : i32
    %169 = tpu.memref_slice %arg3[%c14_i32_152, %c0_i32_153] : memref<16x128xf32, #tpu.memory_space<vmem>> -> memref<1x128xf32, #tpu.memory_space<vmem>>
    %170 = tpu.memref_slice %arg4[%c14_i32_149] : memref<16x!tpu.dma_semaphore, #tpu.memory_space<semaphore_mem>> -> memref<1x!tpu.dma_semaphore, #tpu.memory_space<semaphore_mem>>
    %171 = tpu.memref_squeeze %170 : memref<1x!tpu.dma_semaphore, #tpu.memory_space<semaphore_mem>> -> memref<!tpu.dma_semaphore, #tpu.memory_space<semaphore_mem>>
    tpu.wait_dma2 semaphore(%171 : memref<!tpu.dma_semaphore, #tpu.memory_space<semaphore_mem>>) src(%168 : memref<1x128xf32, #tpu.memory_space<any>>) dst(%169 : memref<1x128xf32, #tpu.memory_space<vmem>>)
    %c15_i32_154 = arith.constant 15 : i32
    %c0_i32_155 = arith.constant 0 : i32
    %c0_i32_156 = arith.constant 0 : i32
    %172 = tpu.memref_slice %arg1[%c0_i32_155, %c0_i32_156] : memref<512x128xf32, #tpu.memory_space<any>> -> memref<1x128xf32, #tpu.memory_space<any>>
    %c15_i32_157 = arith.constant 15 : i32
    %c0_i32_158 = arith.constant 0 : i32
    %173 = tpu.memref_slice %arg3[%c15_i32_157, %c0_i32_158] : memref<16x128xf32, #tpu.memory_space<vmem>> -> memref<1x128xf32, #tpu.memory_space<vmem>>
    %174 = tpu.memref_slice %arg4[%c15_i32_154] : memref<16x!tpu.dma_semaphore, #tpu.memory_space<semaphore_mem>> -> memref<1x!tpu.dma_semaphore, #tpu.memory_space<semaphore_mem>>
    %175 = tpu.memref_squeeze %174 : memref<1x!tpu.dma_semaphore, #tpu.memory_space<semaphore_mem>> -> memref<!tpu.dma_semaphore, #tpu.memory_space<semaphore_mem>>
    tpu.wait_dma2 semaphore(%175 : memref<!tpu.dma_semaphore, #tpu.memory_space<semaphore_mem>>) src(%172 : memref<1x128xf32, #tpu.memory_space<any>>) dst(%173 : memref<1x128xf32, #tpu.memory_space<vmem>>)
    %c0_159 = arith.constant 0 : index
    %c0_160 = arith.constant 0 : index
    %176 = vector.load %arg3[%c0_159, %c0_160] : memref<16x128xf32, #tpu.memory_space<vmem>>, vector<16x128xf32>
    %cst = arith.constant 11.3137083 : f32
    %177 = vector.broadcast %cst : f32 to vector<16x128xf32>
    %178 = arith.mulf %176, %177 : vector<16x128xf32>
    %c0_161 = arith.constant 0 : index
    %c0_162 = arith.constant 0 : index
    %179 = vector.load %arg2[%c0_161, %c0_162] : memref<16x128xf32, #tpu.memory_space<vmem>>, vector<16x128xf32>
    tpu.vector_store %arg2[%c0_161, %c0_162], %178 {strides = array<i32>} : memref<16x128xf32, #tpu.memory_space<vmem>>, vector<16x128xf32>,
    return
  }
}

</mosaic_0001>

<bundles_post_ra>
// kernel: tpu_custom_call.1
= control target key start
LH: loop header
LB: loop body
LE: loop exit
PB: predicated region body
PF: predicated region fallthrough
CT: control target
= control target key end

     0   :  { %7 = vsyncpa [#allocation6], 0  ;;  %s1460_s0 = inlined_call_operand.hbm [shape: s32[16], index: 0, kind: input, shape index: {}]   ;;  %s1461_s1 = inlined_call_operand.hbm [shape: f32[512,128], index: 1, kind: input, shape index: {}]   ;;  %s1462_s2 = inlined_call_operand.hbm [shape: f32[16,128], index: 2, kind: output, shape index: {}]  }
   0x1   :  { %8 = vsyncpa [#allocation5], 0  ;;  %s14_s11 = sshll.u32 %s1460_s0, 4  ;;  %s1161_s12 = smov [#allocation4]   ;;  %s15_s11 = int_to_ptr.hbm [resolvable:$true] %s14_s11 }
   0x2   :  { %17 = dma.hbm_to_smem %s15_s11, 16, %s1161_s12, [#allocation6]  }
   0x3   :  { %1125 = dma.done.wait [#allocation6], 16  }
   0x4   :  { %1126 = vsyncadd [#allocation6], 4294967280 }
   0x5   :  { %22 = sfence }
   0x6   :  { %s23_s13 = sld [smem:[#allocation4]]  ;;  %s1162_s14 = smov [#allocation2]  }
   0x7   :  { %s1199_s15 = sshll.u32 %s1162_s14, 4  ;;  %s547_s16 = sld [smem:[#allocation4 + $0x1]]  ;;  %s39_s15 = int_to_ptr.vmem [resolvable:$true] %s1199_s15 }
   0x8   :  { %s1163_s17 = smov [#allocation2 + $0x1]   ;;  %s1204_s19 = sld [smem:[#allocation4 + $0x2]] }
   0x9   :  { %s1202_s18 = sshll.u32 %s1163_s17, 4  ;;  %s1164_s0 = smov [#allocation2 + $0x2]   ;;  %s60_s18 = int_to_ptr.vmem [resolvable:$true] %s1202_s18 }
   0xa   :  { %s1207_s20 = sshll.u32 %s1164_s0, 4  ;;  %s1209_s21 = sld [smem:[#allocation4 + $0x3]]  ;;  %s81_s20 = int_to_ptr.vmem [resolvable:$true] %s1207_s20 }
   0xb   :  { %s1221_s6 = scalar_lea.hbm %s1461_s1, 512 }
   0xc   :  { %p24_p0 = scmp.gt.s32.totalorder %s23_s13, 0  ;;  %p542_p1 = scmp.lt.s32.totalorder %s23_s13, 511 }
   0xd   :  { %p43_p2 = scmp.gt.s32.totalorder %s547_s16, 0  ;;  %p548_p3 = scmp.lt.s32.totalorder %s547_s16, 511 }
   0xe   :  { %s1464_s13 = smov (!%p24_p0, %s23_s13), 0  ;;  %p64_p4 = scmp.gt.s32.totalorder %s1204_s19, 0 }
   0xf   :  { %s1466_s16 = smov (!%p43_p2, %s547_s16), 0  ;;  %s1468_s13 = smov (!%p542_p1, %s1464_s13), 511 }
  0x10   :  { %s1470_s16 = smov (!%p548_p3, %s1466_s16), 511  ;;  %s28_s24 = scalar_lea.hbm %s1461_s1, %s1468_s13 }
  0x11   :  { %s36_s25 = sshll.u32 %s28_s24, 4  ;;  %s47_s28 = scalar_lea.hbm %s1461_s1, %s1470_s16  ;;  %s37_s25 = int_to_ptr.hbm [resolvable:$true] %s36_s25 }
  0x12   :  { %s57_s29 = sshll.u32 %s47_s28, 4  ;;  %s717_s30 = sshra.s32 %s37_s25, 4  ;;  %s718_s30 = int_to_ptr.hbm [resolvable:$true] %s717_s30  ;;  %s58_s29 = int_to_ptr.hbm [resolvable:$true] %s57_s29 }
  0x13   :  { %s719_s3 = scalar_lea.hbm %s718_s30, 1  ;;  %p722_p6 = scmp.lt.s32.totalorder %s718_s30, %s1461_s1 }
  0x14   :  { %p720_p5 = scmp.ne.s32.totalorder %s718_s30, %s719_s3  ;;  %p723_p7 = scmp.lt.s32.totalorder %s1221_s6, %s719_s3 }
  0x16   :  { %p724_p8 = por %p723_p7, %p722_p6 }
  0x18   :  { %p725_p9 = pnand %p724_p8, %p720_p5 }
  0x1a   :  { %728 = shalt.err (!%p725_p9)  }
  0x1b   :  { %41 = dma.hbm_to_vmem [thread:$0]  %s37_s25, 16, %s39_s15, [#allocation3] }
  0x1c   :  { %p554_p10 = scmp.lt.s32.totalorder %s1204_s19, 511  ;;  %s741_s9 = sshra.s32 %s58_s29, 4  ;;  %s742_s9 = int_to_ptr.hbm [resolvable:$true] %s741_s9 }
  0x1d   :  { %s743_s10 = scalar_lea.hbm %s742_s9, 1  ;;  %p746_p12 = scmp.lt.s32.totalorder %s742_s9, %s1461_s1 }
  0x1e   :  { %p744_p11 = scmp.ne.s32.totalorder %s742_s9, %s743_s10  ;;  %p747_p13 = scmp.lt.s32.totalorder %s1221_s6, %s743_s10 }
  0x20   :  { %p748_p0 = por %p747_p13, %p746_p12 }
  0x22   :  { %p749_p1 = pnand %p748_p0, %p744_p11 }
  0x24   :  { %752 = shalt.err (!%p749_p1)  }
  0x25   :  { %62 = dma.hbm_to_vmem [thread:$0]  %s58_s29, 16, %s60_s18, [#allocation3 + $0x1] }
  0x26   :  { %s65_s13 = scalar_select %p64_p4, %s1204_s19, 0 }
  0x27   :  { %p85_p2 = scmp.gt.s32.totalorder %s1209_s21, 0  ;;  %p560_p3 = scmp.lt.s32.totalorder %s1209_s21, 511 }
  0x28   :  { %s1472_s13 = smov (!%p554_p10, %s65_s13), 511  ;;  %s1165_s22 = smov [#allocation2 + $0x3]  }
  0x29   :  { %s86_s14 = scalar_select %p85_p2, %s1209_s21, 0 }
  0x2a   :  { %s68_s17 = scalar_lea.hbm %s1461_s1, %s1472_s13  ;;  %s1248_s23 = sshll.u32 %s1165_s22, 4  ;;  %s102_s23 = int_to_ptr.vmem [resolvable:$true] %s1248_s23 }
  0x2b   :  { %s78_s0 = sshll.u32 %s68_s17, 4  ;;  %s79_s0 = int_to_ptr.hbm [resolvable:$true] %s78_s0 }
  0x2c   :  { %s765_s24 = sshra.s32 %s79_s0, 4  ;;  %s766_s24 = int_to_ptr.hbm [resolvable:$true] %s765_s24 }
  0x2d   :  { %s767_s18 = scalar_lea.hbm %s766_s24, 1  ;;  %p770_p5 = scmp.lt.s32.totalorder %s766_s24, %s1461_s1 }
  0x2e   :  { %p768_p4 = scmp.ne.s32.totalorder %s766_s24, %s767_s18  ;;  %p771_p6 = scmp.lt.s32.totalorder %s1221_s6, %s767_s18 }
  0x30   :  { %p772_p7 = por %p771_p6, %p770_p5 }
  0x32   :  { %p773_p8 = pnand %p772_p7, %p768_p4 }
  0x34   :  { %776 = shalt.err (!%p773_p8)  }
  0x35   :  { %83 = dma.hbm_to_vmem [thread:$0]  %s79_s0, 16, %s81_s20, [#allocation3 + $0x2] }
  0x36   :  { %s1474_s14 = smov (!%p560_p3, %s86_s14), 511  ;;  %s565_s19 = sld [smem:[#allocation4 + $0x4]] }
  0x37   :  { %s89_s29 = scalar_lea.hbm %s1461_s1, %s1474_s14  ;;  %s1166_s3 = smov [#allocation2 + $0x4]  }
  0x38   :  { %s99_s30 = sshll.u32 %s89_s29, 4  ;;  %s1260_s4 = sshll.u32 %s1166_s3, 4  ;;  %s100_s30 = int_to_ptr.hbm [resolvable:$true] %s99_s30  ;;  %s123_s4 = int_to_ptr.vmem [resolvable:$true] %s1260_s4 }
  0x39   :  { %s789_s5 = sshra.s32 %s100_s30, 4  ;;  %s790_s5 = int_to_ptr.hbm [resolvable:$true] %s789_s5 }
  0x3a   :  { %s791_s20 = scalar_lea.hbm %s790_s5, 1  ;;  %p794_p10 = scmp.lt.s32.totalorder %s790_s5, %s1461_s1 }
  0x3b   :  { %p792_p9 = scmp.ne.s32.totalorder %s790_s5, %s791_s20  ;;  %p795_p11 = scmp.lt.s32.totalorder %s1221_s6, %s791_s20 }
  0x3d   :  { %p796_p12 = por %p795_p11, %p794_p10 }
  0x3f   :  { %p797_p13 = pnand %p796_p12, %p792_p9 }
  0x41   :  { %800 = shalt.err (!%p797_p13)  }
  0x42   :  { %104 = dma.hbm_to_vmem [thread:$0]  %s100_s30, 16, %s102_s23, [#allocation3 + $0x3] }
  0x43   :  { %s1267_s8 = sld [smem:[#allocation4 + $0x5]]  ;;  %p106_p0 = scmp.gt.s32.totalorder %s565_s19, 0 }
  0x44   :  { %p566_p1 = scmp.lt.s32.totalorder %s565_s19, 511  ;;  %s1167_s9 = smov [#allocation2 + $0x5]  }
  0x45   :  { %s1269_s10 = sshll.u32 %s1167_s9, 4  ;;  %s577_s11 = sld [smem:[#allocation4 + $0x6]]  ;;  %s144_s10 = int_to_ptr.vmem [resolvable:$true] %s1269_s10 }
  0x46   :  { %s1476_s19 = smov (!%p106_p0, %s565_s19), 0  ;;  %s1168_s15 = smov [#allocation2 + $0x6]  }
  0x47   :  { %s1478_s19 = smov (!%p566_p1, %s1476_s19), 511  ;;  %s1277_s16 = sshll.u32 %s1168_s15, 4  ;;  %s165_s16 = int_to_ptr.vmem [resolvable:$true] %s1277_s16 }
  0x48   :  { %s110_s14 = scalar_lea.hbm %s1461_s1, %s1478_s19 }
  0x49   :  { %p127_p2 = scmp.gt.s32.totalorder %s1267_s8, 0  ;;  %p572_p3 = scmp.lt.s32.totalorder %s1267_s8, 511 }
  0x4a   :  { %s120_s17 = sshll.u32 %s110_s14, 4  ;;  %s121_s17 = int_to_ptr.hbm [resolvable:$true] %s120_s17 }
  0x4b   :  { %p148_p4 = scmp.gt.s32.totalorder %s577_s11, 0  ;;  %p578_p5 = scmp.lt.s32.totalorder %s577_s11, 511 }
  0x4c   :  { %s813_s0 = sshra.s32 %s121_s17, 4  ;;  %s814_s0 = int_to_ptr.hbm [resolvable:$true] %s813_s0 }
  0x4d   :  { %s815_s22 = scalar_lea.hbm %s814_s0, 1  ;;  %p818_p7 = scmp.lt.s32.totalorder %s814_s0, %s1461_s1 }
  0x4e   :  { %p816_p6 = scmp.ne.s32.totalorder %s814_s0, %s815_s22  ;;  %p819_p8 = scmp.lt.s32.totalorder %s1221_s6, %s815_s22 }
  0x50   :  { %p820_p9 = por %p819_p8, %p818_p7 }
  0x52   :  { %p821_p10 = pnand %p820_p9, %p816_p6 }
  0x54   :  { %824 = shalt.err (!%p821_p10)  }
  0x55   :  { %125 = dma.hbm_to_vmem [thread:$0]  %s121_s17, 16, %s123_s4, [#allocation3 + $0x4] }
  0x56   :  { %s128_s18 = scalar_select %p127_p2, %s1267_s8, 0 }
  0x57   :  { %s149_s25 = scalar_select %p148_p4, %s577_s11, 0 }
  0x58   :  { %s1480_s18 = smov (!%p572_p3, %s128_s18), 511 }
  0x59   :  { %s1482_s25 = smov (!%p578_p5, %s149_s25), 511  ;;  %s131_s27 = scalar_lea.hbm %s1461_s1, %s1480_s18 }
  0x5a   :  { %s141_s28 = sshll.u32 %s131_s27, 4  ;;  %s152_s3 = scalar_lea.hbm %s1461_s1, %s1482_s25  ;;  %s142_s28 = int_to_ptr.hbm [resolvable:$true] %s141_s28 }
  0x5b   :  { %s162_s4 = sshll.u32 %s152_s3, 4  ;;  %s837_s5 = sshra.s32 %s142_s28, 4  ;;  %s838_s5 = int_to_ptr.hbm [resolvable:$true] %s837_s5  ;;  %s163_s4 = int_to_ptr.hbm [resolvable:$true] %s162_s4 }
  0x5c   :  { %s839_s20 = scalar_lea.hbm %s838_s5, 1  ;;  %p842_p12 = scmp.lt.s32.totalorder %s838_s5, %s1461_s1 }
  0x5d   :  { %p840_p11 = scmp.ne.s32.totalorder %s838_s5, %s839_s20  ;;  %p843_p13 = scmp.lt.s32.totalorder %s1221_s6, %s839_s20 }
  0x5f   :  { %p844_p0 = por %p843_p13, %p842_p12 }
  0x61   :  { %p845_p1 = pnand %p844_p0, %p840_p11 }
  0x63   :  { %848 = shalt.err (!%p845_p1)  }
  0x64   :  { %146 = dma.hbm_to_vmem [thread:$0]  %s142_s28, 16, %s144_s10, [#allocation3 + $0x5] }
  0x65   :  { %s583_s8 = sld [smem:[#allocation4 + $0x7]]  ;;  %s861_s9 = sshra.s32 %s163_s4, 4  ;;  %s862_s9 = int_to_ptr.hbm [resolvable:$true] %s861_s9 }
  0x66   :  { %s863_s11 = scalar_lea.hbm %s862_s9, 1  ;;  %p866_p3 = scmp.lt.s32.totalorder %s862_s9, %s1461_s1 }
  0x67   :  { %p864_p2 = scmp.ne.s32.totalorder %s862_s9, %s863_s11  ;;  %p867_p4 = scmp.lt.s32.totalorder %s1221_s6, %s863_s11 }
  0x69   :  { %p868_p5 = por %p867_p4, %p866_p3 }
  0x6b   :  { %p869_p6 = pnand %p868_p5, %p864_p2 }
  0x6d   :  { %872 = shalt.err (!%p869_p6)  }
  0x6e   :  { %167 = dma.hbm_to_vmem [thread:$0]  %s163_s4, 16, %s165_s16, [#allocation3 + $0x6] }
  0x6f   :  { %s1309_s14 = sld [smem:[#allocation4 + $0x8]]  ;;  %s1169_s10 = smov [#allocation2 + $0x7]  }
  0x70   :  { %s1311_s15 = sshll.u32 %s1169_s10, 4  ;;  %s1170_s17 = smov [#allocation2 + $0x8]   ;;  %s186_s15 = int_to_ptr.vmem [resolvable:$true] %s1311_s15 }
  0x71   :  { %s1314_s0 = sshll.u32 %s1170_s17, 4  ;;  %s1317_s22 = sld [smem:[#allocation4 + $0x9]]  ;;  %s207_s0 = int_to_ptr.vmem [resolvable:$true] %s1314_s0 }
  0x72   :  { %p169_p7 = scmp.gt.s32.totalorder %s583_s8, 0  ;;  %p584_p8 = scmp.lt.s32.totalorder %s583_s8, 511 }
  0x73   :  { %s1319_s16 = sld [smem:[#allocation4 + $0xa]]  ;;  %s1171_s19 = smov [#allocation2 + $0x9]  }
  0x74   :  { %s1484_s8 = smov (!%p169_p7, %s583_s8), 0  ;;  %s1329_s27 = sshll.u32 %s1171_s19, 4  ;;  %s228_s27 = int_to_ptr.vmem [resolvable:$true] %s1329_s27 }
  0x75   :  { %p190_p9 = scmp.gt.s32.totalorder %s1309_s14, 0  ;;  %p590_p10 = scmp.lt.s32.totalorder %s1309_s14, 511 }
  0x76   :  { %s1486_s8 = smov (!%p584_p8, %s1484_s8), 511 }
  0x77   :  { %s191_s23 = scalar_select %p190_p9, %s1309_s14, 0 }
  0x78   :  { %s173_s25 = scalar_lea.hbm %s1461_s1, %s1486_s8  ;;  %p211_p11 = scmp.gt.s32.totalorder %s1317_s22, 0 }
  0x79   :  { %s183_s26 = sshll.u32 %s173_s25, 4  ;;  %p596_p12 = scmp.lt.s32.totalorder %s1317_s22, 511  ;;  %s184_s26 = int_to_ptr.hbm [resolvable:$true] %s183_s26 }
  0x7a   :  { %s885_s28 = sshra.s32 %s184_s26, 4  ;;  %s886_s28 = int_to_ptr.hbm [resolvable:$true] %s885_s28 }
  0x7b   :  { %s887_s29 = scalar_lea.hbm %s886_s28, 1  ;;  %p890_p0 = scmp.lt.s32.totalorder %s886_s28, %s1461_s1 }
  0x7c   :  { %p888_p13 = scmp.ne.s32.totalorder %s886_s28, %s887_s29  ;;  %p891_p1 = scmp.lt.s32.totalorder %s1221_s6, %s887_s29 }
  0x7e   :  { %p892_p2 = por %p891_p1, %p890_p0 }
  0x80   :  { %p893_p3 = pnand %p892_p2, %p888_p13 }
  0x82   :  { %896 = shalt.err (!%p893_p3)  }
  0x83   :  { %188 = dma.hbm_to_vmem [thread:$0]  %s184_s26, 16, %s186_s15, [#allocation3 + $0x7] }
  0x84   :  { %s1488_s23 = smov (!%p590_p10, %s191_s23), 511  ;;  %p232_p4 = scmp.gt.s32.totalorder %s1319_s16, 0 }
  0x85   :  { %s212_s4 = scalar_select %p211_p11, %s1317_s22, 0 }
  0x86   :  { %s194_s21 = scalar_lea.hbm %s1461_s1, %s1488_s23  ;;  %p602_p5 = scmp.lt.s32.totalorder %s1319_s16, 511 }
  0x87   :  { %s204_s7 = sshll.u32 %s194_s21, 4  ;;  %s205_s7 = int_to_ptr.hbm [resolvable:$true] %s204_s7 }
  0x88   :  { %s909_s8 = sshra.s32 %s205_s7, 4  ;;  %s910_s8 = int_to_ptr.hbm [resolvable:$true] %s909_s8 }
  0x89   :  { %s911_s9 = scalar_lea.hbm %s910_s8, 1  ;;  %p914_p7 = scmp.lt.s32.totalorder %s910_s8, %s1461_s1 }
  0x8a   :  { %p912_p6 = scmp.ne.s32.totalorder %s910_s8, %s911_s9  ;;  %p915_p8 = scmp.lt.s32.totalorder %s1221_s6, %s911_s9 }
  0x8c   :  { %p916_p9 = por %p915_p8, %p914_p7 }
  0x8e   :  { %p917_p10 = pnand %p916_p9, %p912_p6 }
  0x90   :  { %920 = shalt.err (!%p917_p10)  }
  0x91   :  { %209 = dma.hbm_to_vmem [thread:$0]  %s205_s7, 16, %s207_s0, [#allocation3 + $0x8] }
  0x92   :  { %s1490_s4 = smov (!%p596_p12, %s212_s4), 511  ;;  %s1172_s23 = smov [#allocation2 + $0xa]  }
  0x93   :  { %s233_s13 = scalar_select %p232_p4, %s1319_s16, 0 }
  0x94   :  { %s215_s15 = scalar_lea.hbm %s1461_s1, %s1490_s4  ;;  %s1362_s24 = sshll.u32 %s1172_s23, 4  ;;  %s249_s24 = int_to_ptr.vmem [resolvable:$true] %s1362_s24 }
  0x95   :  { %s225_s17 = sshll.u32 %s215_s15, 4  ;;  %s226_s17 = int_to_ptr.hbm [resolvable:$true] %s225_s17 }
  0x96   :  { %s933_s18 = sshra.s32 %s226_s17, 4  ;;  %s934_s18 = int_to_ptr.hbm [resolvable:$true] %s933_s18 }
  0x97   :  { %s935_s25 = scalar_lea.hbm %s934_s18, 1  ;;  %p938_p13 = scmp.lt.s32.totalorder %s934_s18, %s1461_s1 }
  0x98   :  { %p936_p11 = scmp.ne.s32.totalorder %s934_s18, %s935_s25  ;;  %p939_p12 = scmp.lt.s32.totalorder %s1221_s6, %s935_s25 }
  0x9a   :  { %p940_p0 = por %p939_p12, %p938_p13 }
  0x9c   :  { %p941_p1 = pnand %p940_p0, %p936_p11 }
  0x9e   :  { %944 = shalt.err (!%p941_p1)  }
  0x9f   :  { %230 = dma.hbm_to_vmem [thread:$0]  %s226_s17, 16, %s228_s27, [#allocation3 + $0x9] }
  0xa0   :  { %s1492_s13 = smov (!%p602_p5, %s233_s13), 511  ;;  %s607_s0 = sld [smem:[#allocation4 + $0xb]] }
  0xa1   :  { %s236_s29 = scalar_lea.hbm %s1461_s1, %s1492_s13  ;;  %s1173_s3 = smov [#allocation2 + $0xb]  }
  0xa2   :  { %s246_s30 = sshll.u32 %s236_s29, 4  ;;  %s1376_s4 = sshll.u32 %s1173_s3, 4  ;;  %s247_s30 = int_to_ptr.hbm [resolvable:$true] %s246_s30  ;;  %s270_s4 = int_to_ptr.vmem [resolvable:$true] %s1376_s4 }
  0xa3   :  { %s1378_s5 = sld [smem:[#allocation4 + $0xc]]  ;;  %s957_s20 = sshra.s32 %s247_s30, 4  ;;  %s958_s20 = int_to_ptr.hbm [resolvable:$true] %s957_s20 }
  0xa4   :  { %s959_s21 = scalar_lea.hbm %s958_s20, 1  ;;  %p962_p3 = scmp.lt.s32.totalorder %s958_s20, %s1461_s1 }
  0xa5   :  { %p960_p2 = scmp.ne.s32.totalorder %s958_s20, %s959_s21  ;;  %p963_p4 = scmp.lt.s32.totalorder %s1221_s6, %s959_s21 }
  0xa7   :  { %p964_p5 = por %p963_p4, %p962_p3 }
  0xa9   :  { %p965_p6 = pnand %p964_p5, %p960_p2 }
  0xab   :  { %968 = shalt.err (!%p965_p6)  }
  0xac   :  { %251 = dma.hbm_to_vmem [thread:$0]  %s247_s30, 16, %s249_s24, [#allocation3 + $0xa] }
  0xad   :  { %s1384_s7 = sld [smem:[#allocation4 + $0xd]]  ;;  %p253_p7 = scmp.gt.s32.totalorder %s607_s0, 0 }
  0xae   :  { %p608_p8 = scmp.lt.s32.totalorder %s607_s0, 511  ;;  %s1174_s8 = smov [#allocation2 + $0xc]  }
  0xaf   :  { %s1387_s9 = sshll.u32 %s1174_s8, 4  ;;  %s1494_s0 = smov (!%p253_p7, %s607_s0), 0  ;;  %s291_s9 = int_to_ptr.vmem [resolvable:$true] %s1387_s9 }
  0xb0   :  { %p274_p9 = scmp.gt.s32.totalorder %s1378_s5, 0  ;;  %s1496_s0 = smov (!%p608_p8, %s1494_s0), 511 }
  0xb1   :  { %s257_s14 = scalar_lea.hbm %s1461_s1, %s1496_s0  ;;  %p614_p10 = scmp.lt.s32.totalorder %s1378_s5, 511 }
  0xb2   :  { %s275_s11 = scalar_select %p274_p9, %s1378_s5, 0 }
  0xb3   :  { %s267_s10 = sshll.u32 %s257_s14, 4  ;;  %p295_p11 = scmp.gt.s32.totalorder %s1384_s7, 0  ;;  %s268_s10 = int_to_ptr.hbm [resolvable:$true] %s267_s10 }
  0xb4   :  { %s981_s15 = sshra.s32 %s268_s10, 4  ;;  %s982_s15 = int_to_ptr.hbm [resolvable:$true] %s981_s15 }
  0xb5   :  { %s983_s17 = scalar_lea.hbm %s982_s15, 1  ;;  %p986_p12 = scmp.lt.s32.totalorder %s982_s15, %s1461_s1 }
  0xb6   :  { %p984_p13 = scmp.ne.s32.totalorder %s982_s15, %s983_s17  ;;  %p987_p0 = scmp.lt.s32.totalorder %s1221_s6, %s983_s17 }
  0xb8   :  { %p988_p1 = por %p987_p0, %p986_p12 }
  0xba   :  { %p989_p2 = pnand %p988_p1, %p984_p13 }
  0xbc   :  { %992 = shalt.err (!%p989_p2)  }
  0xbd   :  { %272 = dma.hbm_to_vmem [thread:$0]  %s268_s10, 16, %s270_s4, [#allocation3 + $0xb] }
  0xbe   :  { %s1498_s11 = smov (!%p614_p10, %s275_s11), 511  ;;  %p620_p3 = scmp.lt.s32.totalorder %s1384_s7, 511 }
  0xbf   :  { %s296_s18 = scalar_select %p295_p11, %s1384_s7, 0 }
  0xc0   :  { %s278_s19 = scalar_lea.hbm %s1461_s1, %s1498_s11  ;;  %s1175_s22 = smov [#allocation2 + $0xd]  }
  0xc1   :  { %s288_s0 = sshll.u32 %s278_s19, 4  ;;  %s1410_s28 = sshll.u32 %s1175_s22, 4  ;;  %s289_s0 = int_to_ptr.hbm [resolvable:$true] %s288_s0  ;;  %s312_s28 = int_to_ptr.vmem [resolvable:$true] %s1410_s28 }
  0xc2   :  { %s1412_s29 = sld [smem:[#allocation4 + $0xe]]  ;;  %s1005_s30 = sshra.s32 %s289_s0, 4  ;;  %s1006_s30 = int_to_ptr.hbm [resolvable:$true] %s1005_s30 }
  0xc3   :  { %s1007_s3 = scalar_lea.hbm %s1006_s30, 1  ;;  %p1010_p5 = scmp.lt.s32.totalorder %s1006_s30, %s1461_s1 }
  0xc4   :  { %p1008_p4 = scmp.ne.s32.totalorder %s1006_s30, %s1007_s3  ;;  %p1011_p6 = scmp.lt.s32.totalorder %s1221_s6, %s1007_s3 }
  0xc6   :  { %p1012_p7 = por %p1011_p6, %p1010_p5 }
  0xc8   :  { %p1013_p8 = pnand %p1012_p7, %p1008_p4 }
  0xca   :  { %1016 = shalt.err (!%p1013_p8)  }
  0xcb   :  { %293 = dma.hbm_to_vmem [thread:$0]  %s289_s0, 16, %s291_s9, [#allocation3 + $0xc] }
  0xcc   :  { %s1500_s18 = smov (!%p620_p3, %s296_s18), 511  ;;  %s1422_s20 = sld [smem:[#allocation4 + $0xf]] }
  0xcd   :  { %s299_s16 = scalar_lea.hbm %s1461_s1, %s1500_s18  ;;  %s1176_s11 = smov [#allocation2 + $0xe]  }
  0xce   :  { %s309_s8 = sshll.u32 %s299_s16, 4  ;;  %s1428_s12 = sshll.u32 %s1176_s11, 4  ;;  %s310_s8 = int_to_ptr.hbm [resolvable:$true] %s309_s8  ;;  %s333_s12 = int_to_ptr.vmem [resolvable:$true] %s1428_s12 }
  0xcf   :  { %p316_p9 = scmp.gt.s32.totalorder %s1412_s29, 0  ;;  %s1029_s13 = sshra.s32 %s310_s8, 4  ;;  %s1030_s13 = int_to_ptr.hbm [resolvable:$true] %s1029_s13 }
  0xd0   :  { %s1031_s14 = scalar_lea.hbm %s1030_s13, 1  ;;  %p1034_p11 = scmp.lt.s32.totalorder %s1030_s13, %s1461_s1 }
  0xd1   :  { %p1032_p10 = scmp.ne.s32.totalorder %s1030_s13, %s1031_s14  ;;  %p1035_p13 = scmp.lt.s32.totalorder %s1221_s6, %s1031_s14 }
  0xd3   :  { %p1036_p12 = por %p1035_p13, %p1034_p11 }
  0xd5   :  { %p1037_p0 = pnand %p1036_p12, %p1032_p10 }
  0xd7   :  { %1040 = shalt.err (!%p1037_p0)  }
  0xd8   :  { %314 = dma.hbm_to_vmem [thread:$0]  %s310_s8, 16, %s312_s28, [#allocation3 + $0xd] }
  0xd9   :  { %s317_s10 = scalar_select %p316_p9, %s1412_s29, 0 }
  0xda   :  { %p626_p1 = scmp.lt.s32.totalorder %s1412_s29, 511  ;;  %p337_p2 = scmp.gt.s32.totalorder %s1422_s20, 0 }
  0xdb   :  { %p632_p3 = scmp.lt.s32.totalorder %s1422_s20, 511  ;;  %s1177_s25 = smov [#allocation2 + $0xf]  }
  0xdc   :  { %s1502_s10 = smov (!%p626_p1, %s317_s10), 511  ;;  %s353_s26 = sshll.u32 %s1177_s25, 4  ;;  %s354_s26 = int_to_ptr.vmem [resolvable:$true] %s353_s26 }
  0xdd   :  { %s338_s15 = scalar_select %p337_p2, %s1422_s20, 0 }
  0xde   :  { %s320_s24 = scalar_lea.hbm %s1461_s1, %s1502_s10 }
  0xdf   :  { %s330_s18 = sshll.u32 %s320_s24, 4  ;;  %s331_s18 = int_to_ptr.hbm [resolvable:$true] %s330_s18 }
  0xe0   :  { %s1053_s19 = sshra.s32 %s331_s18, 4  ;;  %s1054_s19 = int_to_ptr.hbm [resolvable:$true] %s1053_s19 }
  0xe1   :  { %s1055_s0 = scalar_lea.hbm %s1054_s19, 1  ;;  %p1058_p5 = scmp.lt.s32.totalorder %s1054_s19, %s1461_s1 }
  0xe2   :  { %p1056_p4 = scmp.ne.s32.totalorder %s1054_s19, %s1055_s0  ;;  %p1059_p6 = scmp.lt.s32.totalorder %s1221_s6, %s1055_s0 }
  0xe4   :  { %p1060_p7 = por %p1059_p6, %p1058_p5 }
  0xe6   :  { %p1061_p8 = pnand %p1060_p7, %p1056_p4 }
  0xe8   :  { %1064 = shalt.err (!%p1061_p8)  }
  0xe9   :  { %335 = dma.hbm_to_vmem [thread:$0]  %s331_s18, 16, %s333_s12, [#allocation3 + $0xe] }
  0xea   :  { %s1504_s15 = smov (!%p632_p3, %s338_s15), 511 }
  0xeb   :  { %s341_s3 = scalar_lea.hbm %s1461_s1, %s1504_s15 }
  0xec   :  { %s351_s4 = sshll.u32 %s341_s3, 4  ;;  %s352_s4 = int_to_ptr.hbm [resolvable:$true] %s351_s4 }
  0xed   :  { %s1077_s5 = sshra.s32 %s352_s4, 4  ;;  %s1078_s5 = int_to_ptr.hbm [resolvable:$true] %s1077_s5 }
  0xee   :  { %s1079_s21 = scalar_lea.hbm %s1078_s5, 1  ;;  %p1082_p10 = scmp.lt.s32.totalorder %s1078_s5, %s1461_s1 }
  0xef   :  { %p1080_p9 = scmp.ne.s32.totalorder %s1078_s5, %s1079_s21  ;;  %p1083_p11 = scmp.lt.s32.totalorder %s1221_s6, %s1079_s21 }
  0xf1   :  { %p1084_p13 = por %p1083_p11, %p1082_p10 }
  0xf3   :  { %p1085_p12 = pnand %p1084_p13, %p1080_p9 }
  0xf5   :  { %1088 = shalt.err (!%p1085_p12)  }
  0xf6   :  { %356 = dma.hbm_to_vmem [thread:$0]  %s352_s4, 16, %s354_s26, [#allocation3 + $0xf] }
  0xf7   :  { %1127 = dma.done.wait [#allocation3], 16 }
  0xf8   :  { %1128 = vsyncadd [#allocation3], 4294967280 }
  0xf9   :  { %1129 = dma.done.wait [#allocation3 + $0x1], 16 }
  0xfa   :  { %1130 = vsyncadd [#allocation3 + $0x1], 4294967280 }
  0xfb   :  { %1131 = dma.done.wait [#allocation3 + $0x2], 16 }
  0xfc   :  { %1132 = vsyncadd [#allocation3 + $0x2], 4294967280 }
  0xfd   :  { %1133 = dma.done.wait [#allocation3 + $0x3], 16 }
  0xfe   :  { %1134 = vsyncadd [#allocation3 + $0x3], 4294967280 }
  0xff   :  { %1135 = dma.done.wait [#allocation3 + $0x4], 16 }
 0x100   :  { %1136 = vsyncadd [#allocation3 + $0x4], 4294967280 }
 0x101   :  { %1137 = dma.done.wait [#allocation3 + $0x5], 16 }
 0x102   :  { %1138 = vsyncadd [#allocation3 + $0x5], 4294967280 }
 0x103   :  { %1139 = dma.done.wait [#allocation3 + $0x6], 16 }
 0x104   :  { %1140 = vsyncadd [#allocation3 + $0x6], 4294967280 }
 0x105   :  { %1141 = dma.done.wait [#allocation3 + $0x7], 16 }
 0x106   :  { %1142 = vsyncadd [#allocation3 + $0x7], 4294967280 }
 0x107   :  { %1143 = dma.done.wait [#allocation3 + $0x8], 16 }
 0x108   :  { %1144 = vsyncadd [#allocation3 + $0x8], 4294967280 }
 0x109   :  { %1145 = dma.done.wait [#allocation3 + $0x9], 16 }
 0x10a   :  { %1146 = vsyncadd [#allocation3 + $0x9], 4294967280 }
 0x10b   :  { %1147 = dma.done.wait [#allocation3 + $0xa], 16 }
 0x10c   :  { %1148 = vsyncadd [#allocation3 + $0xa], 4294967280 }
 0x10d   :  { %1149 = dma.done.wait [#allocation3 + $0xb], 16 }
 0x10e   :  { %1150 = vsyncadd [#allocation3 + $0xb], 4294967280 }
 0x10f   :  { %1151 = dma.done.wait [#allocation3 + $0xc], 16 }
 0x110   :  { %1152 = vsyncadd [#allocation3 + $0xc], 4294967280 }
 0x111   :  { %1153 = dma.done.wait [#allocation3 + $0xd], 16 }
 0x112   :  { %1154 = vsyncadd [#allocation3 + $0xd], 4294967280 }
 0x113   :  { %1155 = dma.done.wait [#allocation3 + $0xe], 16 }
 0x114   :  { %1156 = vsyncadd [#allocation3 + $0xe], 4294967280 }
 0x115   :  { %1157 = dma.done.wait [#allocation3 + $0xf], 16 }
 0x116   :  { %1158 = vsyncadd [#allocation3 + $0xf], 4294967280  ;;  %s1178_s1 = smov [#allocation7]   ;;  %s402_s11 = sshll.u32 %s1462_s2, 4  ;;  %v390_v0 = vld [vmem:[#allocation2] sm:$0xff]  ;;  %v391_v1 = vld [vmem:[#allocation2 + $0x8] sm:$0xff]  ;;  %s403_s11 = int_to_ptr.hbm [resolvable:$true] %s402_s11 }
 0x117   :  { %s400_s6 = sshll.u32 %s1178_s1, 4  ;;  %v392_v2 = vmul.f32 11.313708, %v390_v0  ;;  %v393_v3 = vmul.f32 11.313708, %v391_v1  ;;  %s1179_s12 = smov 128   ;;  %s401_s6 = int_to_ptr.vmem [resolvable:$true] %s400_s6 }
 0x118   :  { %s1180_s13 = smov 8  }
 0x119   :  { %394 = vst [vmem:[#allocation7] sm:$0xff] %v392_v2 }
 0x11a   :  { %395 = vst [vmem:[#allocation7 + $0x8] sm:$0xff] %v393_v3 }
 0x11b   :  { %408 = dma.vmem_to_hbm [thread:$0]  %s401_s6, 256, %s403_s11, [#allocation5], %s1179_s12, %s1179_s12, %s1180_s13  }
 0x11c   :  { %1159 = dma.done.wait [#allocation5], 256  }
 0x11d   :  { %1160 = vsyncadd [#allocation5], 4294967040 }
 0x11e   :  { %413 = vsyncpa [#allocation5], 1 }
 0x11f   :  { %414 = vsyncpa [#allocation6], 1 }
 0x120   :  { %415 = vsyncmov [#allocation3] }
 0x123   :  { %s416_s14 = vpop.sfrf %415 }
 0x124   :  { %p637_p0 = scmp.ne.s32.totalorder %s416_s14, 0 }
 0x126   :  { %420 = shalt.err (%p637_p0)  }
 0x127   :  { %422 = vsyncmov [#allocation3 + $0x1] }
 0x12a   :  { %s423_s2 = vpop.sfrf %422 }
 0x12b   :  { %p638_p1 = scmp.ne.s32.totalorder %s423_s2, 0 }
 0x12d   :  { %427 = shalt.err (%p638_p1)  }
 0x12e   :  { %429 = vsyncmov [#allocation3 + $0x2] }
 0x131   :  { %s430_s9 = vpop.sfrf %429 }
 0x132   :  { %p639_p2 = scmp.ne.s32.totalorder %s430_s9, 0 }
 0x134   :  { %434 = shalt.err (%p639_p2)  }
 0x135   :  { %436 = vsyncmov [#allocation3 + $0x3] }
 0x138   :  { %s437_s7 = vpop.sfrf %436 }
 0x139   :  { %p640_p3 = scmp.ne.s32.totalorder %s437_s7, 0 }
 0x13b   :  { %441 = shalt.err (%p640_p3)  }
 0x13c   :  { %443 = vsyncmov [#allocation3 + $0x4] }
 0x13f   :  { %s444_s10 = vpop.sfrf %443 }
 0x140   :  { %p641_p4 = scmp.ne.s32.totalorder %s444_s10, 0 }
 0x142   :  { %448 = shalt.err (%p641_p4)  }
 0x143   :  { %450 = vsyncmov [#allocation3 + $0x5] }
 0x146   :  { %s451_s15 = vpop.sfrf %450 }
 0x147   :  { %p642_p5 = scmp.ne.s32.totalorder %s451_s15, 0 }
 0x149   :  { %455 = shalt.err (%p642_p5)  }
 0x14a   :  { %457 = vsyncmov [#allocation3 + $0x6] }
 0x14d   :  { %s458_s17 = vpop.sfrf %457 }
 0x14e   :  { %p643_p6 = scmp.ne.s32.totalorder %s458_s17, 0 }
 0x150   :  { %462 = shalt.err (%p643_p6)  }
 0x151   :  { %464 = vsyncmov [#allocation3 + $0x7] }
 0x154   :  { %s465_s23 = vpop.sfrf %464 }
 0x155   :  { %p644_p7 = scmp.ne.s32.totalorder %s465_s23, 0 }
 0x157   :  { %469 = shalt.err (%p644_p7)  }
 0x158   :  { %471 = vsyncmov [#allocation3 + $0x8] }
 0x15b   :  { %s472_s24 = vpop.sfrf %471 }
 0x15c   :  { %p645_p8 = scmp.ne.s32.totalorder %s472_s24, 0 }
 0x15e   :  { %476 = shalt.err (%p645_p8)  }
 0x15f   :  { %478 = vsyncmov [#allocation3 + $0x9] }
 0x162   :  { %s479_s18 = vpop.sfrf %478 }
 0x163   :  { %p646_p9 = scmp.ne.s32.totalorder %s479_s18, 0 }
 0x165   :  { %483 = shalt.err (%p646_p9)  }
 0x166   :  { %485 = vsyncmov [#allocation3 + $0xa] }
 0x169   :  { %s486_s25 = vpop.sfrf %485 }
 0x16a   :  { %p647_p10 = scmp.ne.s32.totalorder %s486_s25, 0 }
 0x16c   :  { %490 = shalt.err (%p647_p10)  }
 0x16d   :  { %492 = vsyncmov [#allocation3 + $0xb] }
 0x170   :  { %s493_s26 = vpop.sfrf %492 }
 0x171   :  { %p648_p11 = scmp.ne.s32.totalorder %s493_s26, 0 }
 0x173   :  { %497 = shalt.err (%p648_p11)  }
 0x174   :  { %499 = vsyncmov [#allocation3 + $0xc] }
 0x177   :  { %s500_s19 = vpop.sfrf %499 }
 0x178   :  { %p649_p13 = scmp.ne.s32.totalorder %s500_s19, 0 }
 0x17a   :  { %504 = shalt.err (%p649_p13)  }
 0x17b   :  { %506 = vsyncmov [#allocation3 + $0xd] }
 0x17e   :  { %s507_s0 = vpop.sfrf %506 }
 0x17f   :  { %p650_p12 = scmp.ne.s32.totalorder %s507_s0, 0 }
 0x181   :  { %511 = shalt.err (%p650_p12)  }
 0x182   :  { %513 = vsyncmov [#allocation3 + $0xe] }
 0x185   :  { %s514_s22 = vpop.sfrf %513 }
 0x186   :  { %p651_p0 = scmp.ne.s32.totalorder %s514_s22, 0 }
 0x188   :  { %518 = shalt.err (%p651_p0)  }
 0x189   :  { %520 = vsyncmov [#allocation3 + $0xf] }
 0x18c   :  { %s521_s28 = vpop.sfrf %520 }
 0x18d   :  { %p652_p1 = scmp.ne.s32.totalorder %s521_s28, 0 }
 0x18f   :  { %525 = shalt.err (%p652_p1)  }

</bundles_post_ra>
